<compile_context>
chip_gen: v7x
topology: tpu7x:2x2x1
jax: 0.10.0
libtpu: 0.0.40
codegen_flags: <defaults>
</compile_context>

<pallas_src>
import functools
from typing import NamedTuple

import jax
import jax.numpy as jnp
from jax.experimental import pallas as pl
from jax.experimental.pallas import tpu as pltpu

BN_EPS = 1e-3  # scvi FCLayers uses nn.BatchNorm1d(..., eps=0.001)

_VMEM_LIMIT = 32 * 1024 * 1024  # safe on v5e/v6e/v7x; covers tile_n=1024 heads


class DecoderConfig(NamedTuple):
    n_hidden: int
    n_output: int
    shared_time: bool


# ------------------------------ kernel helpers -------------------------------
def _softplus(x):
    # torch.nn.Softplus (beta=1): log(1 + exp(x)), numerically stable form
    return jnp.maximum(x, 0.0) + jnp.log1p(jnp.exp(-jnp.abs(x)))


def _sigmoid(x):
    # 1/(1+exp(-x)) with the divide routed to the (otherwise idle) EUP slot.
    return pl.reciprocal(1.0 + jnp.exp(-x), approx=True)


def _fc_layer(x, w_ref, b_ref, g_ref, beta_ref):
    # One scvi FCLayers layer: Linear -> BatchNorm1d (training-mode batch
    # statistics, biased variance, eps=1e-3) -> ReLU.  dropout_rate=0 -> no-op.
    # NOTE: BN uses FULL-batch statistics, so the batch axis must never be
    # tiled across a grid.
    h = jnp.dot(x, w_ref[...], preferred_element_type=jnp.float32) + b_ref[...]
    mean = jnp.mean(h, axis=0, keepdims=True)
    var = jnp.mean((h - mean) ** 2, axis=0, keepdims=True)
    h = (h - mean) * jax.lax.rsqrt(var + BN_EPS) * g_ref[...] + beta_ref[...]
    return jnp.maximum(h, 0.0)


# --------------------------------- kernels -----------------------------------
def _prologue_kernel(*refs, shared_time: bool, n_hidden: int, batch: int):
    """Fused first-layer FCs (+ shared-time rho column). Runs once (grid=(1,))."""
    H = n_hidden
    if shared_time:
        (z_in_ref, z_ref,
         w_rc, b_rc, g_rc, be_rc,            # fused rho FC (only the "up" layer)
         w_pc, b_pc, g_pc, be_pc,            # fused pi FC ([up | down])
         w_rho_col, b_rho_col,               # rho head column 0, padded to 128
         h_pu_out, h_pd_out, rho_col_out) = refs
    else:
        (z_in_ref, z_ref,
         w_rc, b_rc, g_rc, be_rc,            # fused rho FC ([up | down])
         w_pc, b_pc, g_pc, be_pc,            # fused pi FC ([up | down])
         h_pu_out, h_pd_out, h_rho_out) = refs

    # Fused first FC layers (per-column BN is identical to per-layer BN).
    h_rho = _fc_layer(z_in_ref[...], w_rc, b_rc, g_rc, be_rc)  # (B,H) or (B,2H)
    h_pi = _fc_layer(z_ref[...], w_pc, b_pc, g_pc, be_pc)      # (B,2H)
    # TODO(synk): if n_hidden is not a multiple of 128, these lane slices force
    # a relayout; pad H in prepare_decoder_params for exotic configs.
    h_pu_out[...] = h_pi[:, :H].astype(h_pu_out.dtype)
    h_pd_out[...] = h_pi[:, H:].astype(h_pd_out.dtype)

    if shared_time:
        # shared_time only ever uses column 0 of the rho-up head: compute just
        # that column (padded to a 128-lane tile); wrapper broadcasts.
        h_ru = h_rho.astype(w_rho_col.dtype)
        rho_col_out[...] = _sigmoid(
            jnp.dot(h_ru, w_rho_col[...], preferred_element_type=jnp.float32)
            + b_rho_col[...])
    else:
        # Stack up/down hidden states along the M axis so the rho head does ONE
        # (2B,H)@(H,tile) matmul per lane tile (shared weights).
        B = batch
        h_rho_out[:B, :] = h_rho[:, :H].astype(h_rho_out.dtype)
        h_rho_out[B:, :] = h_rho[:, H:].astype(h_rho_out.dtype)


def _pi_head_kernel(h_pu_ref, h_pd_ref, w_u, b_u, w_d, b_d, out_u, out_d):
    """One lane tile of the two pi heads per grid step (megacore-parallel)."""
    out_u[...] = _softplus(
        jnp.dot(h_pu_ref[...], w_u[...], preferred_element_type=jnp.float32)
        + b_u[...]).astype(out_u.dtype)
    out_d[...] = _softplus(
        jnp.dot(h_pd_ref[...], w_d[...], preferred_element_type=jnp.float32)
        + b_d[...]).astype(out_d.dtype)


def _rho_head_kernel(h_ref, w_ref, b_ref, out_ref):
    """Fused up/down rho head: (2B,H)@(H,tile) per grid step."""
    out_ref[...] = _sigmoid(
        jnp.dot(h_ref[...], w_ref[...], preferred_element_type=jnp.float32)
        + b_ref[...])


# ----------------------------- parameter prep --------------------------------
def _round_up(x, m):
    return ((x + m - 1) // m) * m


def _pad_cols(a, n):
    pad = n - a.shape[1]
    return a if pad == 0 else jnp.pad(a, ((0, 0), (0, pad)))


def prepare_decoder_params(params, *, shared_time=True, head_dtype=jnp.bfloat16):
    """ONE-TIME parameter prep (fuse / pad / cast). Do NOT call per forward.

    head_dtype=bfloat16 is the right default on v5e/v6e/v7x: the MXU consumes
    bf16 natively on all three and it halves head-weight DMA; accumulation and
    all elementwise math stay f32.
    """
    H = params["w_rho_up"].shape[1]
    G = params["w_px_rho_up"].shape[1]
    P2 = _round_up(2 * G, 128)   # padded pi-head width (free reshape when ==2G)
    Gp = _round_up(G, 128)       # padded rho-head width (non-shared path)

    prepped = {}
    if shared_time:
        # rho-down FC is dead work under shared_time -> drop it entirely.
        prepped["w_rc"] = params["w_rho_up"]
        prepped["b_rc"] = params["b_rho_up"]
        prepped["g_rc"] = params["g_rho_up"]
        prepped["be_rc"] = params["beta_rho_up"]
        prepped["w_rho_col"] = _pad_cols(params["w_px_rho_up"][:, :1], 128).astype(head_dtype)
        prepped["b_rho_col"] = _pad_cols(params["b_px_rho_up"][:, :1], 128)
    else:
        prepped["w_rc"] = jnp.concatenate([params["w_rho_up"], params["w_rho_down"]], axis=1)
        prepped["b_rc"] = jnp.concatenate([params["b_rho_up"], params["b_rho_down"]], axis=1)
        prepped["g_rc"] = jnp.concatenate([params["g_rho_up"], params["g_rho_down"]], axis=1)
        prepped["be_rc"] = jnp.concatenate([params["beta_rho_up"], params["beta_rho_down"]], axis=1)
        # NOTE: the original module reuses px_rho_decoder_up for BOTH branches.
        prepped["w_rho_h"] = _pad_cols(params["w_px_rho_up"], Gp).astype(head_dtype)
        prepped["b_rho_h"] = _pad_cols(params["b_px_rho_up"], Gp)

    prepped["w_pc"] = jnp.concatenate([params["w_pi_up"], params["w_pi_down"]], axis=1)
    prepped["b_pc"] = jnp.concatenate([params["b_pi_up"], params["b_pi_down"]], axis=1)
    prepped["g_pc"] = jnp.concatenate([params["g_pi_up"], params["g_pi_down"]], axis=1)
    prepped["be_pc"] = jnp.concatenate([params["beta_pi_up"], params["beta_pi_down"]], axis=1)

    prepped["w_piu"] = _pad_cols(params["w_px_pi_up"], P2).astype(head_dtype)
    prepped["b_piu"] = _pad_cols(params["b_px_pi_up"], P2)
    prepped["w_pid"] = _pad_cols(params["w_px_pi_down"], P2).astype(head_dtype)
    prepped["b_pid"] = _pad_cols(params["b_px_pi_down"], P2)

    cfg = DecoderConfig(n_hidden=H, n_output=G, shared_time=shared_time)
    return prepped, cfg


# ---------------------------------- forward ----------------------------------
def _full_spec(shape):
    nd = len(shape)
    return pl.BlockSpec(shape, lambda j: (0,) * nd)


def _lane_tile(rows, cols):
    return pl.BlockSpec((rows, cols), lambda j: (0, j))


def _pick_tile(width, requested):
    if requested is not None:
        tn = requested
    elif width <= 1024:
        tn = width
    else:
        tn = next(c for c in (1024, 512, 256, 128) if width % c == 0)
    assert width % tn == 0 and tn % 128 == 0, (width, tn)
    return tn


def decoder_velovi_forward(z, prepped, cfg, latent_dim=None, *,
                           out_dtype=jnp.float32, tile_n=None,
                           expand_shared_rho=True):
    """JAX/Pallas equivalent of DecoderVELOVI.forward (linear_decoder=False).

    `prepped, cfg` come from prepare_decoder_params (one-time prep).
    out_dtype: dtype of the px_pi outputs (set bfloat16 to halve writeback if
    downstream tolerates it). expand_shared_rho=False returns the shared-time
    px_rho compactly as (B,1,2) instead of materializing the (B,G,2) broadcast.
    """
    # TODO(synk): linear_decoder=True path is not implemented (it references
    # self.rho_first_decoder, which does not exist in the original module).
    # TODO(synk): n_cat_list covariate injection and eval-mode (running-stat)
    # BatchNorm are not implemented; dropout_rate=0 assumed.
    z = z.astype(jnp.float32)
    B, _ = z.shape
    H, G, shared_time = cfg.n_hidden, cfg.n_output, cfg.shared_time
    head_dtype = prepped["w_piu"].dtype
    P2 = prepped["w_piu"].shape[1]

    if latent_dim is not None:
        mask = jnp.zeros_like(z).at[..., latent_dim].set(1.0)
        z_in = z * mask
    else:
        z_in = z

    pro_cparams = pltpu.CompilerParams(
        dimension_semantics=("arbitrary",), vmem_limit_bytes=_VMEM_LIMIT)
    head_cparams = pltpu.CompilerParams(
        # "parallel" lets v7x shard lane tiles across its two TensorCores.
        dimension_semantics=("parallel",), vmem_limit_bytes=_VMEM_LIMIT)

    # ---- prologue: fused first-layer FC+BN+ReLU (+ shared-time rho column) --
    pro_args = [z_in, z,
                prepped["w_rc"], prepped["b_rc"], prepped["g_rc"], prepped["be_rc"],
                prepped["w_pc"], prepped["b_pc"], prepped["g_pc"], prepped["be_pc"]]
    if shared_time:
        pro_args += [prepped["w_rho_col"], prepped["b_rho_col"]]
        pro_out_shape = (jax.ShapeDtypeStruct((B, H), head_dtype),
                         jax.ShapeDtypeStruct((B, H), head_dtype),
                         jax.ShapeDtypeStruct((B, 128), jnp.float32))
    else:
        pro_out_shape = (jax.ShapeDtypeStruct((B, H), head_dtype),
                         jax.ShapeDtypeStruct((B, H), head_dtype),
                         jax.ShapeDtypeStruct((2 * B, H), head_dtype))

    pro_kernel = functools.partial(_prologue_kernel, shared_time=shared_time,
                                   n_hidden=H, batch=B)
    pro_outs = pl.pallas_call(
        pro_kernel,
        out_shape=pro_out_shape,
        grid_spec=pltpu.PrefetchScalarGridSpec(
            num_scalar_prefetch=0,
            grid=(1,),
            in_specs=[_full_spec(a.shape) for a in pro_args],
            out_specs=tuple(_full_spec(s.shape) for s in pro_out_shape)),
        compiler_params=pro_cparams,
    )(*pro_args)

    if shared_time:
        h_pu, h_pd, rho_col = pro_outs
    else:
        h_pu, h_pd, h_rho_cat = pro_outs

    # ---- pi heads: lane-tiled over padded 2*n_output, megacore-parallel -----
    tn = _pick_tile(P2, tile_n)
    pi_up_flat, pi_dn_flat = pl.pallas_call(
        _pi_head_kernel,
        out_shape=(jax.ShapeDtypeStruct((B, P2), out_dtype),
                   jax.ShapeDtypeStruct((B, P2), out_dtype)),
        grid_spec=pltpu.PrefetchScalarGridSpec(
            num_scalar_prefetch=0,
            grid=(P2 // tn,),
            in_specs=[_full_spec((B, H)), _full_spec((B, H)),
                      _lane_tile(H, tn), _lane_tile(1, tn),
                      _lane_tile(H, tn), _lane_tile(1, tn)],
            out_specs=(_lane_tile(B, tn), _lane_tile(B, tn))),
        compiler_params=head_cparams,
    )(h_pu, h_pd, prepped["w_piu"], prepped["b_piu"],
      prepped["w_pid"], prepped["b_pid"])

    # torch.reshape(..., (B, n_output, 2)) on the 2*n_output logits.
    if P2 == 2 * G:
        px_pi_up = pi_up_flat.reshape(B, G, 2)      # free metadata reshape
        px_pi_down = pi_dn_flat.reshape(B, G, 2)
    else:
        px_pi_up = pi_up_flat[:, :2 * G].reshape(B, G, 2)
        px_pi_down = pi_dn_flat[:, :2 * G].reshape(B, G, 2)

    # ---- rho -----------------------------------------------------------------
    if shared_time:
        rho0 = rho_col[:, :1]                       # shared-time column (B,1)
        if expand_shared_rho:
            # .repeat(1, n_output) + stack  (matches the torch shape contract)
            px_rho = jnp.broadcast_to(rho0[:, :, None], (B, G, 2))
        else:
            px_rho = jnp.broadcast_to(rho0[:, :, None], (B, 1, 2))
    else:
        Gp = prepped["w_rho_h"].shape[1]
        tr = _pick_tile(Gp, None)
        rho_cat = pl.pallas_call(
            _rho_head_kernel,
            out_shape=jax.ShapeDtypeStruct((2 * B, Gp), jnp.float32),
            grid_spec=pltpu.PrefetchScalarGridSpec(
                num_scalar_prefetch=0,
                grid=(Gp // tr,),
                in_specs=[_full_spec((2 * B, H)),
                          _lane_tile(H, tr), _lane_tile(1, tr)],
                out_specs=_lane_tile(2 * B, tr)),
            compiler_params=head_cparams,
        )(h_rho_cat, prepped["w_rho_h"], prepped["b_rho_h"])
        rho_up = rho_cat[:B, :G]
        rho_dn = rho_cat[B:, :G]
        px_rho = jnp.stack([rho_up, rho_dn], axis=-1)

    return px_pi_up, px_pi_down, px_rho


# ------------------------- parameter initialization --------------------------
def init_params(key, n_input, n_hidden, n_output):
    def linear(k, fan_in, fan_out):
        kw, kb = jax.random.split(k)
        lim = 1.0 / jnp.sqrt(jnp.asarray(fan_in, jnp.float32))
        w = jax.random.uniform(kw, (fan_in, fan_out), jnp.float32, -lim, lim)
        b = jax.random.uniform(kb, (1, fan_out), jnp.float32, -lim, lim)
        return w, b

    keys = jax.random.split(key, 8)
    params = {}
    for name, k in zip(["rho_up", "rho_down", "pi_up", "pi_down"], keys[:4]):
        w, b = linear(k, n_input, n_hidden)
        params[f"w_{name}"] = w
        params[f"b_{name}"] = b
        params[f"g_{name}"] = jnp.ones((1, n_hidden), jnp.float32)      # BN gamma
        params[f"beta_{name}"] = jnp.zeros((1, n_hidden), jnp.float32)  # BN beta
    params["w_px_rho_up"], params["b_px_rho_up"] = linear(keys[4], n_hidden, n_output)
    params["w_px_pi_up"], params["b_px_pi_up"] = linear(keys[5], n_hidden, 2 * n_output)
    params["w_px_pi_down"], params["b_px_pi_down"] = linear(keys[6], n_hidden, 2 * n_output)
    return params


# ------------------------------ pure-JAX reference ----------------------------
def _reference_forward(z, params, latent_dim=None, shared_time=True):
    def fc(x, name):
        h = x @ params[f"w_{name}"] + params[f"b_{name}"]
        mean = jnp.mean(h, axis=0, keepdims=True)
        var = jnp.mean((h - mean) ** 2, axis=0, keepdims=True)
        h = (h - mean) * jax.lax.rsqrt(var + BN_EPS) * params[f"g_{name}"] + params[f"beta_{name}"]
        return jnp.maximum(h, 0.0)

    z_in = z
    if latent_dim is not None:
        z_in = z * jnp.zeros_like(z).at[..., latent_dim].set(1.0)

    rho_up = jax.nn.sigmoid(fc(z_in, "rho_up") @ params["w_px_rho_up"] + params["b_px_rho_up"])
    rho_dn = jax.nn.sigmoid(fc(z_in, "rho_down") @ params["w_px_rho_up"] + params["b_px_rho_up"])
    if shared_time:
        rho_up = jnp.broadcast_to(rho_up[:, 0:1], rho_up.shape)
        rho_dn = rho_up
    px_rho = jnp.stack([rho_up, rho_dn], axis=-1)

    G = params["w_px_rho_up"].shape[1]
    pi_up = jax.nn.softplus(fc(z, "pi_up") @ params["w_px_pi_up"] + params["b_px_pi_up"])
    pi_dn = jax.nn.softplus(fc(z, "pi_down") @ params["w_px_pi_down"] + params["b_px_pi_down"])
    return pi_up.reshape(-1, G, 2), pi_dn.reshape(-1, G, 2), px_rho


if __name__ == "__main__":
    key = jax.random.PRNGKey(0)
    kz, kp = jax.random.split(key)

    batch, n_input, n_hidden, n_output = 8, 8, 32, 16
    z = jax.random.normal(kz, (batch, n_input), jnp.float32)
    params = init_params(kp, n_input, n_hidden, n_output)

    names = ["px_pi_up", "px_pi_down", "px_rho"]
    configs = [dict(latent_dim=None, shared_time=True),
               dict(latent_dim=2, shared_time=False)]

    for c in configs:
        ref = _reference_forward(z, params, latent_dim=c["latent_dim"],
                                 shared_time=c["shared_time"])

        # f32 heads: tight check against the pure-JAX reference.
        prepped, cfg = prepare_decoder_params(
            params, shared_time=c["shared_time"], head_dtype=jnp.float32)
        out = decoder_velovi_forward(z, prepped, cfg, latent_dim=c["latent_dim"])
        out = jax.block_until_ready(out)
        for name, a, b in zip(names, out, ref):
            assert a.shape == b.shape, (name, c, a.shape, b.shape)
            assert jnp.allclose(a, b, atol=2e-3, rtol=2e-3), (
                name, c, float(jnp.max(jnp.abs(a - b))))

        # bf16 heads (default production path on v5e/v6e/v7x): looser tolerance.
        prepped, cfg = prepare_decoder_params(
            params, shared_time=c["shared_time"], head_dtype=jnp.bfloat16)
        out = decoder_velovi_forward(z, prepped, cfg, latent_dim=c["latent_dim"])
        out = jax.block_until_ready(out)
        for name, a, b in zip(names, out, ref):
            assert a.shape == b.shape, (name, c, a.shape, b.shape)
            assert jnp.allclose(a, b, atol=5e-2, rtol=5e-2), (
                name, c, float(jnp.max(jnp.abs(a - b))))

    print("KERNEL_OK")
</pallas_src>

<mosaic_0001>
module attributes {stable_mosaic.version = 11 : i64} {
  func.func @_prologue_kernel(%arg0: i32, %arg1: memref<8x8xf32, #tpu.memory_space<vmem>>, %arg2: memref<8x8xf32, #tpu.memory_space<vmem>>, %arg3: memref<8x32xf32, #tpu.memory_space<vmem>>, %arg4: memref<1x32xf32, #tpu.memory_space<vmem>>, %arg5: memref<1x32xf32, #tpu.memory_space<vmem>>, %arg6: memref<1x32xf32, #tpu.memory_space<vmem>>, %arg7: memref<8x64xf32, #tpu.memory_space<vmem>>, %arg8: memref<1x64xf32, #tpu.memory_space<vmem>>, %arg9: memref<1x64xf32, #tpu.memory_space<vmem>>, %arg10: memref<1x64xf32, #tpu.memory_space<vmem>>, %arg11: memref<32x128xf32, #tpu.memory_space<vmem>>, %arg12: memref<1x128xf32, #tpu.memory_space<vmem>>, %arg13: memref<8x32xf32, #tpu.memory_space<vmem>>, %arg14: memref<8x32xf32, #tpu.memory_space<vmem>>, %arg15: memref<8x128xf32, #tpu.memory_space<vmem>>) attributes {dimension_semantics = [#tpu.dimension_semantics<arbitrary>], iteration_bounds = array<i64: 1>, scalar_prefetch = 0 : i64, scratch_operands = 0 : i64, tpu.core_type = #tpu.core_type<tc>, window_params = [{pipeline_mode = #tpu.pipeline_mode<synchronous>, transform_indices = @transform_0, window_bounds = array<i64: 8, 8>}, {pipeline_mode = #tpu.pipeline_mode<synchronous>, transform_indices = @transform_1, window_bounds = array<i64: 8, 8>}, {pipeline_mode = #tpu.pipeline_mode<synchronous>, transform_indices = @transform_2, window_bounds = array<i64: 8, 32>}, {pipeline_mode = #tpu.pipeline_mode<synchronous>, transform_indices = @transform_3, window_bounds = array<i64: 1, 32>}, {pipeline_mode = #tpu.pipeline_mode<synchronous>, transform_indices = @transform_4, window_bounds = array<i64: 1, 32>}, {pipeline_mode = #tpu.pipeline_mode<synchronous>, transform_indices = @transform_5, window_bounds = array<i64: 1, 32>}, {pipeline_mode = #tpu.pipeline_mode<synchronous>, transform_indices = @transform_6, window_bounds = array<i64: 8, 64>}, {pipeline_mode = #tpu.pipeline_mode<synchronous>, transform_indices = @transform_7, window_bounds = array<i64: 1, 64>}, {pipeline_mode = #tpu.pipeline_mode<synchronous>, transform_indices = @transform_8, window_bounds = array<i64: 1, 64>}, {pipeline_mode = #tpu.pipeline_mode<synchronous>, transform_indices = @transform_9, window_bounds = array<i64: 1, 64>}, {pipeline_mode = #tpu.pipeline_mode<synchronous>, transform_indices = @transform_10, window_bounds = array<i64: 32, 128>}, {pipeline_mode = #tpu.pipeline_mode<synchronous>, transform_indices = @transform_11, window_bounds = array<i64: 1, 128>}, {pipeline_mode = #tpu.pipeline_mode<synchronous>, transform_indices = @transform_12, window_bounds = array<i64: 8, 32>}, {pipeline_mode = #tpu.pipeline_mode<synchronous>, transform_indices = @transform_13, window_bounds = array<i64: 8, 32>}, {pipeline_mode = #tpu.pipeline_mode<synchronous>, transform_indices = @transform_14, window_bounds = array<i64: 8, 128>}]} {
    %c0 = arith.constant 0 : index
    %c0_0 = arith.constant 0 : index
    %0 = vector.load %arg1[%c0, %c0_0] : memref<8x8xf32, #tpu.memory_space<vmem>>, vector<8x8xf32>
    %c0_1 = arith.constant 0 : index
    %c0_2 = arith.constant 0 : index
    %1 = vector.load %arg3[%c0_1, %c0_2] : memref<8x32xf32, #tpu.memory_space<vmem>>, vector<8x32xf32>
    %cst = arith.constant dense<0.000000e+00> : vector<8x32xf32>
    %2 = tpu.matmul %0, %1, %cst {dimension_numbers = #tpu.dot_dimension_numbers<[1], [0], [0], [1], [0, 0, 1, 1], [], []>} : vector<8x8xf32>, vector<8x32xf32>, vector<8x32xf32> -> vector<8x32xf32>
    %c0_3 = arith.constant 0 : index
    %c0_4 = arith.constant 0 : index
    %3 = vector.load %arg4[%c0_3, %c0_4] : memref<1x32xf32, #tpu.memory_space<vmem>>, vector<1x32xf32>
    %4 = vector.broadcast %3 : vector<1x32xf32> to vector<8x32xf32>
    %5 = arith.addf %2, %4 : vector<8x32xf32>
    %cst_5 = arith.constant dense<0.000000e+00> : vector<32xf32>
    %6 = vector.multi_reduction <add>, %5, %cst_5 [0] : vector<8x32xf32> to vector<32xf32>
    %7 = vector.shape_cast %6 : vector<32xf32> to vector<1x32xf32>
    %cst_6 = arith.constant 8.000000e+00 : f32
    %8 = vector.broadcast %cst_6 : f32 to vector<1x32xf32>
    %9 = arith.divf %7, %8 : vector<1x32xf32>
    %10 = vector.broadcast %9 : vector<1x32xf32> to vector<8x32xf32>
    %11 = arith.subf %5, %10 : vector<8x32xf32>
    %12 = arith.mulf %11, %11 : vector<8x32xf32>
    %cst_7 = arith.constant dense<0.000000e+00> : vector<32xf32>
    %13 = vector.multi_reduction <add>, %12, %cst_7 [0] : vector<8x32xf32> to vector<32xf32>
    %14 = vector.shape_cast %13 : vector<32xf32> to vector<1x32xf32>
    %cst_8 = arith.constant 8.000000e+00 : f32
    %15 = vector.broadcast %cst_8 : f32 to vector<1x32xf32>
    %16 = arith.divf %14, %15 : vector<1x32xf32>
    %17 = vector.broadcast %9 : vector<1x32xf32> to vector<8x32xf32>
    %18 = arith.subf %5, %17 : vector<8x32xf32>
    %cst_9 = arith.constant 1.000000e-03 : f32
    %19 = vector.broadcast %cst_9 : f32 to vector<1x32xf32>
    %20 = arith.addf %16, %19 : vector<1x32xf32>
    %21 = math.rsqrt %20 : vector<1x32xf32>
    %22 = vector.broadcast %21 : vector<1x32xf32> to vector<8x32xf32>
    %23 = arith.mulf %18, %22 : vector<8x32xf32>
    %c0_10 = arith.constant 0 : index
    %c0_11 = arith.constant 0 : index
    %24 = vector.load %arg5[%c0_10, %c0_11] : memref<1x32xf32, #tpu.memory_space<vmem>>, vector<1x32xf32>
    %25 = vector.broadcast %24 : vector<1x32xf32> to vector<8x32xf32>
    %26 = arith.mulf %23, %25 : vector<8x32xf32>
    %c0_12 = arith.constant 0 : index
    %c0_13 = arith.constant 0 : index
    %27 = vector.load %arg6[%c0_12, %c0_13] : memref<1x32xf32, #tpu.memory_space<vmem>>, vector<1x32xf32>
    %28 = vector.broadcast %27 : vector<1x32xf32> to vector<8x32xf32>
    %29 = arith.addf %26, %28 : vector<8x32xf32>
    %cst_14 = arith.constant 0.000000e+00 : f32
    %30 = vector.broadcast %cst_14 : f32 to vector<8x32xf32>
    %31 = arith.maximumf %29, %30 : vector<8x32xf32>
    %c0_15 = arith.constant 0 : index
    %c0_16 = arith.constant 0 : index
    %32 = vector.load %arg2[%c0_15, %c0_16] : memref<8x8xf32, #tpu.memory_space<vmem>>, vector<8x8xf32>
    %c0_17 = arith.constant 0 : index
    %c0_18 = arith.constant 0 : index
    %33 = vector.load %arg7[%c0_17, %c0_18] : memref<8x64xf32, #tpu.memory_space<vmem>>, vector<8x64xf32>
    %cst_19 = arith.constant dense<0.000000e+00> : vector<8x64xf32>
    %34 = tpu.matmul %32, %33, %cst_19 {dimension_numbers = #tpu.dot_dimension_numbers<[1], [0], [0], [1], [0, 0, 1, 1], [], []>} : vector<8x8xf32>, vector<8x64xf32>, vector<8x64xf32> -> vector<8x64xf32>
    %c0_20 = arith.constant 0 : index
    %c0_21 = arith.constant 0 : index
    %35 = vector.load %arg8[%c0_20, %c0_21] : memref<1x64xf32, #tpu.memory_space<vmem>>, vector<1x64xf32>
    %36 = vector.broadcast %35 : vector<1x64xf32> to vector<8x64xf32>
    %37 = arith.addf %34, %36 : vector<8x64xf32>
    %cst_22 = arith.constant dense<0.000000e+00> : vector<64xf32>
    %38 = vector.multi_reduction <add>, %37, %cst_22 [0] : vector<8x64xf32> to vector<64xf32>
    %39 = vector.shape_cast %38 : vector<64xf32> to vector<1x64xf32>
    %cst_23 = arith.constant 8.000000e+00 : f32
    %40 = vector.broadcast %cst_23 : f32 to vector<1x64xf32>
    %41 = arith.divf %39, %40 : vector<1x64xf32>
    %42 = vector.broadcast %41 : vector<1x64xf32> to vector<8x64xf32>
    %43 = arith.subf %37, %42 : vector<8x64xf32>
    %44 = arith.mulf %43, %43 : vector<8x64xf32>
    %cst_24 = arith.constant dense<0.000000e+00> : vector<64xf32>
    %45 = vector.multi_reduction <add>, %44, %cst_24 [0] : vector<8x64xf32> to vector<64xf32>
    %46 = vector.shape_cast %45 : vector<64xf32> to vector<1x64xf32>
    %cst_25 = arith.constant 8.000000e+00 : f32
    %47 = vector.broadcast %cst_25 : f32 to vector<1x64xf32>
    %48 = arith.divf %46, %47 : vector<1x64xf32>
    %49 = vector.broadcast %41 : vector<1x64xf32> to vector<8x64xf32>
    %50 = arith.subf %37, %49 : vector<8x64xf32>
    %cst_26 = arith.constant 1.000000e-03 : f32
    %51 = vector.broadcast %cst_26 : f32 to vector<1x64xf32>
    %52 = arith.addf %48, %51 : vector<1x64xf32>
    %53 = math.rsqrt %52 : vector<1x64xf32>
    %54 = vector.broadcast %53 : vector<1x64xf32> to vector<8x64xf32>
    %55 = arith.mulf %50, %54 : vector<8x64xf32>
    %c0_27 = arith.constant 0 : index
    %c0_28 = arith.constant 0 : index
    %56 = vector.load %arg9[%c0_27, %c0_28] : memref<1x64xf32, #tpu.memory_space<vmem>>, vector<1x64xf32>
    %57 = vector.broadcast %56 : vector<1x64xf32> to vector<8x64xf32>
    %58 = arith.mulf %55, %57 : vector<8x64xf32>
    %c0_29 = arith.constant 0 : index
    %c0_30 = arith.constant 0 : index
    %59 = vector.load %arg10[%c0_29, %c0_30] : memref<1x64xf32, #tpu.memory_space<vmem>>, vector<1x64xf32>
    %60 = vector.broadcast %59 : vector<1x64xf32> to vector<8x64xf32>
    %61 = arith.addf %58, %60 : vector<8x64xf32>
    %cst_31 = arith.constant 0.000000e+00 : f32
    %62 = vector.broadcast %cst_31 : f32 to vector<8x64xf32>
    %63 = arith.maximumf %61, %62 : vector<8x64xf32>
    %64 = vector.extract_strided_slice %63 {offsets = [0, 0], sizes = [8, 32], strides = [1, 1]} : vector<8x64xf32> to vector<8x32xf32>
    %c0_32 = arith.constant 0 : index
    %c0_33 = arith.constant 0 : index
    %65 = vector.load %arg13[%c0_32, %c0_33] : memref<8x32xf32, #tpu.memory_space<vmem>>, vector<8x32xf32>
    tpu.vector_store %arg13[%c0_32, %c0_33], %64 {strides = array<i32>} : memref<8x32xf32, #tpu.memory_space<vmem>>, vector<8x32xf32>,
    %66 = vector.extract_strided_slice %63 {offsets = [0, 32], sizes = [8, 32], strides = [1, 1]} : vector<8x64xf32> to vector<8x32xf32>
    %c0_34 = arith.constant 0 : index
    %c0_35 = arith.constant 0 : index
    %67 = vector.load %arg14[%c0_34, %c0_35] : memref<8x32xf32, #tpu.memory_space<vmem>>, vector<8x32xf32>
    tpu.vector_store %arg14[%c0_34, %c0_35], %66 {strides = array<i32>} : memref<8x32xf32, #tpu.memory_space<vmem>>, vector<8x32xf32>,
    %c0_36 = arith.constant 0 : index
    %c0_37 = arith.constant 0 : index
    %68 = vector.load %arg11[%c0_36, %c0_37] : memref<32x128xf32, #tpu.memory_space<vmem>>, vector<32x128xf32>
    %cst_38 = arith.constant dense<0.000000e+00> : vector<8x128xf32>
    %69 = tpu.matmul %31, %68, %cst_38 {dimension_numbers = #tpu.dot_dimension_numbers<[1], [0], [0], [1], [0, 0, 1, 1], [], []>} : vector<8x32xf32>, vector<32x128xf32>, vector<8x128xf32> -> vector<8x128xf32>
    %c0_39 = arith.constant 0 : index
    %c0_40 = arith.constant 0 : index
    %70 = vector.load %arg12[%c0_39, %c0_40] : memref<1x128xf32, #tpu.memory_space<vmem>>, vector<1x128xf32>
    %71 = vector.broadcast %70 : vector<1x128xf32> to vector<8x128xf32>
    %72 = arith.addf %69, %71 : vector<8x128xf32>
    %cst_41 = arith.constant 0.000000e+00 : f32
    %73 = vector.broadcast %cst_41 : f32 to vector<8x128xf32>
    %74 = arith.subf %73, %72 : vector<8x128xf32>
    %75 = math.exp %74 : vector<8x128xf32>
    %cst_42 = arith.constant 1.000000e+00 : f32
    %76 = vector.broadcast %cst_42 : f32 to vector<8x128xf32>
    %77 = arith.addf %76, %75 : vector<8x128xf32>
    %78 = tpu.reciprocal %77 {approx = true} : vector<8x128xf32> -> vector<8x128xf32>
    %c0_43 = arith.constant 0 : index
    %c0_44 = arith.constant 0 : index
    %79 = vector.load %arg15[%c0_43, %c0_44] : memref<8x128xf32, #tpu.memory_space<vmem>>, vector<8x128xf32>
    tpu.vector_store %arg15[%c0_43, %c0_44], %78 {strides = array<i32>} : memref<8x128xf32, #tpu.memory_space<vmem>>, vector<8x128xf32>,
    return
  }
  func.func @transform_0(%arg0: i32) -> (i32, i32) {
    %c0_i32 = arith.constant 0 : i32
    %c0_i32_0 = arith.constant 0 : i32
    %c0_i32_1 = arith.constant 0 : i32
    return %c0_i32, %c0_i32_0 : i32, i32
  }
  func.func @transform_1(%arg0: i32) -> (i32, i32) {
    %c0_i32 = arith.constant 0 : i32
    %c0_i32_0 = arith.constant 0 : i32
    %c0_i32_1 = arith.constant 0 : i32
    return %c0_i32, %c0_i32_0 : i32, i32
  }
  func.func @transform_2(%arg0: i32) -> (i32, i32) {
    %c0_i32 = arith.constant 0 : i32
    %c0_i32_0 = arith.constant 0 : i32
    %c0_i32_1 = arith.constant 0 : i32
    return %c0_i32, %c0_i32_0 : i32, i32
  }
  func.func @transform_3(%arg0: i32) -> (i32, i32) {
    %c0_i32 = arith.constant 0 : i32
    %c0_i32_0 = arith.constant 0 : i32
    %c0_i32_1 = arith.constant 0 : i32
    return %c0_i32, %c0_i32_0 : i32, i32
  }
  func.func @transform_4(%arg0: i32) -> (i32, i32) {
    %c0_i32 = arith.constant 0 : i32
    %c0_i32_0 = arith.constant 0 : i32
    %c0_i32_1 = arith.constant 0 : i32
    return %c0_i32, %c0_i32_0 : i32, i32
  }
  func.func @transform_5(%arg0: i32) -> (i32, i32) {
    %c0_i32 = arith.constant 0 : i32
    %c0_i32_0 = arith.constant 0 : i32
    %c0_i32_1 = arith.constant 0 : i32
    return %c0_i32, %c0_i32_0 : i32, i32
  }
  func.func @transform_6(%arg0: i32) -> (i32, i32) {
    %c0_i32 = arith.constant 0 : i32
    %c0_i32_0 = arith.constant 0 : i32
    %c0_i32_1 = arith.constant 0 : i32
    return %c0_i32, %c0_i32_0 : i32, i32
  }
  func.func @transform_7(%arg0: i32) -> (i32, i32) {
    %c0_i32 = arith.constant 0 : i32
    %c0_i32_0 = arith.constant 0 : i32
    %c0_i32_1 = arith.constant 0 : i32
    return %c0_i32, %c0_i32_0 : i32, i32
  }
  func.func @transform_8(%arg0: i32) -> (i32, i32) {
    %c0_i32 = arith.constant 0 : i32
    %c0_i32_0 = arith.constant 0 : i32
    %c0_i32_1 = arith.constant 0 : i32
    return %c0_i32, %c0_i32_0 : i32, i32
  }
  func.func @transform_9(%arg0: i32) -> (i32, i32) {
    %c0_i32 = arith.constant 0 : i32
    %c0_i32_0 = arith.constant 0 : i32
    %c0_i32_1 = arith.constant 0 : i32
    return %c0_i32, %c0_i32_0 : i32, i32
  }
  func.func @transform_10(%arg0: i32) -> (i32, i32) {
    %c0_i32 = arith.constant 0 : i32
    %c0_i32_0 = arith.constant 0 : i32
    %c0_i32_1 = arith.constant 0 : i32
    return %c0_i32, %c0_i32_0 : i32, i32
  }
  func.func @transform_11(%arg0: i32) -> (i32, i32) {
    %c0_i32 = arith.constant 0 : i32
    %c0_i32_0 = arith.constant 0 : i32
    %c0_i32_1 = arith.constant 0 : i32
    return %c0_i32, %c0_i32_0 : i32, i32
  }
  func.func @transform_12(%arg0: i32) -> (i32, i32) {
    %c0_i32 = arith.constant 0 : i32
    %c0_i32_0 = arith.constant 0 : i32
    %c0_i32_1 = arith.constant 0 : i32
    return %c0_i32, %c0_i32_0 : i32, i32
  }
  func.func @transform_13(%arg0: i32) -> (i32, i32) {
    %c0_i32 = arith.constant 0 : i32
    %c0_i32_0 = arith.constant 0 : i32
    %c0_i32_1 = arith.constant 0 : i32
    return %c0_i32, %c0_i32_0 : i32, i32
  }
  func.func @transform_14(%arg0: i32) -> (i32, i32) {
    %c0_i32 = arith.constant 0 : i32
    %c0_i32_0 = arith.constant 0 : i32
    %c0_i32_1 = arith.constant 0 : i32
    return %c0_i32, %c0_i32_0 : i32, i32
  }
}

</mosaic_0001>

<bundles_post_ra>
// kernel: tpu_custom_call.1
= control target key start
LH: loop header
LB: loop body
LE: loop exit
PB: predicated region body
PF: predicated region fallthrough
CT: control target
= control target key end

     0   :  { %20 = vsyncpa [#allocation3], 0  ;;  %s960_s0 = inlined_call_operand.hbm [shape: f32[8,8], index: 0, kind: input, shape index: {}]   ;;  %s961_s1 = inlined_call_operand.hbm [shape: f32[8,8], index: 1, kind: input, shape index: {}]   ;;  %s962_s2 = inlined_call_operand.hbm [shape: f32[8,32], index: 2, kind: input, shape index: {}]   ;;  %s963_s3 = inlined_call_operand.vmem [shape: f32[1,32], index: 3, kind: input, shape index: {}]   ;;  %s964_s4 = inlined_call_operand.vmem [shape: f32[1,32], index: 4, kind: input, shape index: {}]   ;;  %s965_s5 = inlined_call_operand.vmem [shape: f32[1,32], index: 5, kind: input, shape index: {}]   ;;  %s966_s6 = inlined_call_operand.hbm [shape: f32[8,64], index: 6, kind: input, shape index: {}]   ;;  %s967_s7 = inlined_call_operand.vmem [shape: f32[1,64], index: 7, kind: input, shape index: {}]   ;;  %s968_s8 = inlined_call_operand.vmem [shape: f32[1,64], index: 8, kind: input, shape index: {}]   ;;  %s969_s9 = inlined_call_operand.hbm [shape: f32[1,64], index: 9, kind: input, shape index: {}]   ;;  %s970_s10 = inlined_call_operand.vmem [shape: f32[32,128], index: 10, kind: input, shape index: {}]   ;;  %s971_s11 = inlined_call_operand.vmem [shape: f32[1,128], index: 11, kind: input, shape index: {}]   ;;  %s972_s12 = inlined_call_operand.hbm [shape: f32[8,32], index: 12, kind: output, shape index: {0}]   ;;  %s973_s13 = inlined_call_operand.hbm [shape: f32[8,32], index: 13, kind: output, shape index: {1}]   ;;  %s974_s14 = inlined_call_operand.hbm [shape: f32[8,128], index: 14, kind: output, shape index: {2}]  }
   0x1   :  { %21 = vsyncpa [#allocation6], 0 }
   0x2   :  { %22 = vsyncpa [#allocation9], 0 }
   0x3   :  { %23 = vsyncpa [#allocation4], 0 }
   0x4   :  { %24 = vsyncpa [#allocation13], 0  ;;  %s740_s29 = smov [#allocation5]   ;;  %s741_s15 = smov [#allocation8]  }
   0x5   :  { %s41_s30 = sshll.u32 %s740_s29, 4  ;;  %s67_s16 = sshll.u32 %s741_s15, 4  ;;  %s42_s30 = int_to_ptr.vmem [resolvable:$true] %s41_s30  ;;  %s68_s16 = int_to_ptr.vmem [resolvable:$true] %s67_s16 }
   0x6   :  { %s554_s19 = scalar_lea.hbm %s961_s1, 128 }
   0x7   :  { %p555_p0 = scmp.ne.s32.totalorder %s961_s1, %s554_s19  ;;  %p558_p1 = scmp.lt.u32.totalorder %s554_s19, %s961_s1 }
   0x9   :  { %p560_p2 = pnand %p558_p1, %p555_p0 }
   0xb   :  { %563 = shalt.err (!%p560_p2)
}
   0xc   :  { %s564_s24 = scalar_lea.vmem %s42_s30, 128  ;;  %p569_p4 = scmp.lt.s32.totalorder %s42_s30, %s42_s30 }
   0xd   :  { %p565_p3 = scmp.ne.s32.totalorder %s42_s30, %s564_s24  ;;  %p570_p5 = scmp.lt.s32.totalorder %s564_s24, %s564_s24 }
   0xf   :  { %p571_p6 = por %p570_p5, %p569_p4 }
  0x11   :  { %p572_p7 = pnand %p571_p6, %p565_p3 }
  0x13   :  { %575 = shalt.err (!%p572_p7)
}
  0x14   :  { %44 = dma.hbm_to_vmem [thread:$0]  %s961_s1, 128, %s42_s30, [#allocation6]  }
  0x15   :  { %s576_s29 = scalar_lea.hbm %s966_s6, 128 }
  0x16   :  { %p577_p8 = scmp.ne.s32.totalorder %s966_s6, %s576_s29  ;;  %p580_p9 = scmp.lt.u32.totalorder %s576_s29, %s966_s6 }
  0x18   :  { %p582_p10 = pnand %p580_p9, %p577_p8 }
  0x1a   :  { %585 = shalt.err (!%p582_p10)
}
  0x1b   :  { %s586_s20 = scalar_lea.vmem %s68_s16, 128  ;;  %p591_p12 = scmp.lt.s32.totalorder %s68_s16, %s68_s16 }
  0x1c   :  { %p587_p11 = scmp.ne.s32.totalorder %s68_s16, %s586_s20  ;;  %p592_p13 = scmp.lt.s32.totalorder %s586_s20, %s586_s20 }
  0x1e   :  { %p593_p0 = por %p592_p13, %p591_p12 }
  0x20   :  { %p594_p1 = pnand %p593_p0, %p587_p11 }
  0x22   :  { %597 = shalt.err (!%p594_p1)
}
  0x23   :  { %70 = dma.hbm_to_vmem [thread:$0]  %s966_s6, 128, %s68_s16, [#allocation9]  }
  0x24   :  { %s742_s21 = smov [#allocation2]   ;;  %s743_s23 = smov [#allocation7]  }
  0x25   :  { %s31_s22 = sshll.u32 %s742_s21, 4  ;;  %s51_s24 = sshll.u32 %s743_s23, 4  ;;  %s32_s22 = int_to_ptr.vmem [resolvable:$true] %s31_s22  ;;  %s52_s24 = int_to_ptr.vmem [resolvable:$true] %s51_s24 }
  0x26   :  { %s598_s27 = scalar_lea.hbm %s960_s0, 128 }
  0x27   :  { %p599_p2 = scmp.ne.s32.totalorder %s960_s0, %s598_s27  ;;  %p602_p3 = scmp.lt.u32.totalorder %s598_s27, %s960_s0 }
  0x29   :  { %p604_p4 = pnand %p602_p3, %p599_p2 }
  0x2b   :  { %607 = shalt.err (!%p604_p4)
}
  0x2c   :  { %s608_s6 = scalar_lea.vmem %s32_s22, 128  ;;  %p613_p6 = scmp.lt.s32.totalorder %s32_s22, %s32_s22 }
  0x2d   :  { %p609_p5 = scmp.ne.s32.totalorder %s32_s22, %s608_s6  ;;  %p614_p7 = scmp.lt.s32.totalorder %s608_s6, %s608_s6 }
  0x2f   :  { %p615_p8 = por %p614_p7, %p613_p6 }
  0x31   :  { %p616_p9 = pnand %p615_p8, %p609_p5 }
  0x33   :  { %619 = shalt.err (!%p616_p9)
}
  0x34   :  { %34 = dma.hbm_to_vmem [thread:$0]  %s960_s0, 128, %s32_s22, [#allocation3]  }
  0x35   :  { %s620_s1 = scalar_lea.hbm %s962_s2, 128 }
  0x36   :  { %p621_p10 = scmp.ne.s32.totalorder %s962_s2, %s620_s1  ;;  %p624_p11 = scmp.lt.u32.totalorder %s620_s1, %s962_s2 }
  0x38   :  { %p626_p12 = pnand %p624_p11, %p621_p10 }
  0x3a   :  { %629 = shalt.err (!%p626_p12)
}
  0x3b   :  { %s630_s26 = scalar_lea.vmem %s52_s24, 128  ;;  %p635_p0 = scmp.lt.s32.totalorder %s52_s24, %s52_s24 }
  0x3c   :  { %p631_p13 = scmp.ne.s32.totalorder %s52_s24, %s630_s26  ;;  %p636_p1 = scmp.lt.s32.totalorder %s630_s26, %s630_s26 }
  0x3e   :  { %p637_p2 = por %p636_p1, %p635_p0 }
  0x40   :  { %p638_p3 = pnand %p637_p2, %p631_p13 }
  0x42   :  { %641 = shalt.err (!%p638_p3)
}
  0x43   :  { %54 = dma.hbm_to_vmem [thread:$0]  %s962_s2, 128, %s52_s24, [#allocation6]  }
  0x44   :  { %s744_s27 = smov [#allocation10]   ;;  %s642_s17 = scalar_lea.hbm %s969_s9, 16 }
  0x45   :  { %s81_s28 = sshll.u32 %s744_s27, 4  ;;  %p643_p4 = scmp.ne.s32.totalorder %s969_s9, %s642_s17  ;;  %s82_s28 = int_to_ptr.vmem [resolvable:$true] %s81_s28 }
  0x46   :  { %p646_p5 = scmp.lt.u32.totalorder %s642_s17, %s969_s9 }
  0x48   :  { %p648_p6 = pnand %p646_p5, %p643_p4 }
  0x4a   :  { %651 = shalt.err (!%p648_p6)
}
  0x4b   :  { %s652_s20 = scalar_lea.vmem %s82_s28, 16  ;;  %s656_s2 = scalar_lea.vmem %s82_s28, 32 }
  0x4c   :  { %p653_p7 = scmp.ne.s32.totalorder %s82_s28, %s652_s20  ;;  %p657_p8 = scmp.lt.s32.totalorder %s82_s28, %s82_s28 }
  0x4d   :  { %p658_p9 = scmp.lt.s32.totalorder %s656_s2, %s652_s20 }
  0x4f   :  { %p659_p10 = por %p658_p9, %p657_p8 }
  0x51   :  { %p660_p11 = pnand %p659_p10, %p653_p7 }
  0x53   :  { %663 = shalt.err (!%p660_p11)
}
  0x54   :  { %84 = dma.hbm_to_vmem [thread:$0]  %s969_s9, 16, %s82_s28, [#allocation9]  }
  0x55   :  { %730 = dma.done.wait [#allocation3], 128  }
  0x56   :  { %731 = vsyncadd [#allocation3], 4294967168 }
  0x57   :  { %732 = dma.done.wait [#allocation6], 256  }
  0x58   :  { %733 = vsyncadd [#allocation6], 4294967040 }
  0x59   :  { %734 = dma.done.wait [#allocation9], 144  }
  0x5a   :  { %735 = vsyncadd [#allocation9], 4294967152  ;;  %v745_v0 = vmov 0.0   ;;  %vm746_vm0 = vmmov 0   ;;  %vm113_vm1 = vcmask 64512   ;;  %v105_v1 = vld [vmem:[#allocation7] sm:$0xff] }
  0x5b   :  { %507 = vmatprep.subr.mxu1 %v745_v0  ;;  %509 = vmatprep.mubr.msk.f32.mxu1 %vm746_vm0, %v745_v0  ;;  %v104_v2 = vld [vmem:[#allocation2] sm:$0xff]  ;;  %v228_v3 = vld [vmem:[#allocation8] sm:$0xff]  ;;  %v227_v4 = vld [vmem:[#allocation5] sm:$0xff]  ;;  %v747_v8 = vmov 0.0|0.0   ;;  %vm187_vm2 = vcmask 261120   ;;  %vm309_vm3 = vcmask 523264  }
  0x5c   :  { %525 = vmatprep.mubr.msk.f32.mxu0 %vm746_vm0, %v745_v0  ;;  %508 = vmatpush3.msra.mxu1 %v105_v1  ;;  %v354_v5 = vld [vmem:[%s970_s10] sm:$0xff]  ;;  %v355_v6 = vld [vmem:[%s970_s10 + $0x8] sm:$0xff]  ;;  %v356_v9 = vld [vmem:[%s970_s10 + $0x10] sm:$0xff]  ;;  %s750_s19 = smov [#allocation12]  }
  0x5d   :  { %510 = vmatmul.mubr.msk.f32.vlgmr.msra.gmra.mrb[0].mxu1 %vm113_vm1, %v104_v2  ;;  %512 = vmatprep.subr.mxu1 %v745_v0  ;;  %v529_v7 = vpack.c.bf16 %v355_v6, %v354_v5  ;;  %v357_v10 = vld [vmem:[%s970_s10 + $0x18] sm:$0xff]  ;;  %v488_v12 = vld [vmem:[%s963_s3] ss:$0 sm:$0xff]  ;;  %s460_s20 = sshll.u32 %s750_s19, 4  ;;  %s461_s20 = int_to_ptr.vmem [resolvable:$true] %s460_s20 }
  0x5e   :  { %513 = vmatpush3.msra.mxu1 %v228_v3  ;;  %514 = vmatprep.mubr.msk.f32.mxu1 %vm746_vm0, %v745_v0  ;;  %v532_v11 = vpack.c.bf16 %v357_v10, %v356_v9  ;;  %v492_v16 = vld [vmem:[%s967_s7] ss:$0 sm:$0xff] }
  0x5f   :  { %528 = vmatprep.subr.bf16.mxu0 %v747_v8  ;;  %v490_v59 = vld [vmem:[%s964_s4] ss:$0 sm:$0xff]  ;;  %s748_s4 = smov 96  }
  0x60   :  { %530 = vmatpush3.bf16.msra.mxu0 %v529_v7  ;;  %v491_v61 = vld [vmem:[%s965_s5] ss:$0 sm:$0xff]  ;;  %s749_s5 = smov [#allocation11]  }
  0x61   :  { %515 = vmatmul.mubr.msk.f32.vlgmr.msra.gmra.mrb[2].mxu1 %vm113_vm1, %v227_v4  ;;  %531 = vmatprep.subr.bf16.mxu0 %v747_v8  ;;  %v494_v0 = vld [vmem:[%s968_s8] ss:$0 sm:$0xff]  ;;  %s450_s18 = sshll.u32 %s749_s5, 4  ;;  %s451_s18 = int_to_ptr.vmem [resolvable:$true] %s450_s18 }
  0x62   :  { %v495_v3 = vld [vmem:[#allocation10] ss:$0 sm:$0xff]  ;;  %s664_s2 = scalar_lea.vmem %s451_s18, 128  ;;  %p669_p13 = scmp.lt.s32.totalorder %s451_s18, %s451_s18 }
  0x63   :  { %p665_p12 = scmp.ne.s32.totalorder %s451_s18, %s664_s2  ;;  %p670_p0 = scmp.lt.s32.totalorder %s664_s2, %s664_s2 }
  0x64   :  { %533 = vmatpush3.bf16.msra.mxu0 %v532_v11 }
  0x65   :  { %p671_p1 = por %p670_p0, %p669_p13 }
  0x67   :  { %p672_p2 = pnand %p671_p1, %p665_p12 }
 0x130   :  { %v183_v13 = vpop.f32.mrb[0].mxu1 }
 0x131   :  { %v184_v14 = vadd.f32 %v488_v12, %v183_v13  ;;  %v511_v15 = vpop.f32.mrb[1].mxu1 }
 0x133   :  { %v188_v17 = vsel %vm187_vm2, %v184_v14, 0.0 }
 0x134   :  { %v189_v18 = vrot.slane %v188_v17, 4  ;;  %v305_v19 = vpop.f32.mrb[2].mxu1 }
 0x135   :  { %v306_v20 = vadd.f32 %v492_v16, %v305_v19  ;;  %v516_v21 = vpop.f32.mrb[3].mxu1 }
 0x136   :  { %v190_v22 = vadd.f32 %v189_v18, %v188_v17 }
 0x137   :  { %v310_v23 = vsel %vm309_vm3, %v306_v20, 0.0 }
 0x138   :  { %v191_v24 = vrot.slane %v190_v22, 2  ;;  %v311_v25 = vrot.slane %v310_v23, 4 }
 0x13a   :  { %v192_v26 = vadd.f32 %v191_v24, %v190_v22  ;;  %v312_v27 = vadd.f32 %v311_v25, %v310_v23 }
 0x13c   :  { %v193_v28 = vrot.slane %v192_v26, 1  ;;  %v313_v29 = vrot.slane %v312_v27, 2 }
 0x13e   :  { %v194_v30 = vadd.f32 %v193_v28, %v192_v26  ;;  %v314_v31 = vadd.f32 %v313_v29, %v312_v27 }
 0x140   :  { %v196_v32 = vmul.f32 0.125, %v194_v30  ;;  %v315_v33 = vrot.slane %v314_v31, 1 }
 0x142   :  { %v197_v34 = vsub.f32 %v184_v14, %v196_v32  ;;  %v316_v35 = vadd.f32 %v315_v33, %v314_v31 }
 0x144   :  { %v198_v36 = vmul.f32 %v197_v34, %v197_v34  ;;  %v317_v37 = vmul.f32 0.125, %v316_v35 }
 0x146   :  { %v199_v38 = vsel %vm187_vm2, %v198_v36, 0.0  ;;  %v318_v39 = vsub.f32 %v306_v20, %v317_v37 }
 0x147   :  { %v200_v40 = vrot.slane %v199_v38, 4 }
 0x148   :  { %v319_v41 = vmul.f32 %v318_v39, %v318_v39 }
 0x149   :  { %v201_v42 = vadd.f32 %v200_v40, %v199_v38 }
 0x14a   :  { %v320_v43 = vsel %vm309_vm3, %v319_v41, 0.0 }
 0x14b   :  { %v202_v44 = vrot.slane %v201_v42, 2  ;;  %v321_v45 = vrot.slane %v320_v43, 4 }
 0x14d   :  { %v203_v46 = vadd.f32 %v202_v44, %v201_v42  ;;  %v322_v47 = vadd.f32 %v321_v45, %v320_v43 }
 0x14f   :  { %v204_v48 = vrot.slane %v203_v46, 1  ;;  %v323_v49 = vrot.slane %v322_v47, 2 }
 0x151   :  { %v205_v50 = vadd.f32 %v204_v48, %v203_v46  ;;  %v324_v51 = vadd.f32 %v323_v49, %v322_v47 }
 0x153   :  { %v206_v52 = vmul.f32 0.125, %v205_v50  ;;  %v325_v53 = vrot.slane %v324_v51, 1 }
 0x155   :  { %v207_v54 = vadd.f32 0.001, %v206_v52  ;;  %v326_v55 = vadd.f32 %v325_v53, %v324_v51 }
 0x157   :  { %546 = vrsqrt.f32 %v207_v54  ;;  %v327_v56 = vmul.f32 0.125, %v326_v55 }
 0x159   :  { %v328_v57 = vadd.f32 0.001, %v327_v56 }
 0x15b   :  { %548 = vrsqrt.f32 %v328_v57 }
 0x161   :  { %v547_v58 = vpop.eup %546 }
 0x162   :  { %v209_v60 = vmul.f32 %v547_v58, %v197_v34 }
 0x164   :  { %v217_v62 = vmul.f32 %v490_v59, %v209_v60 }
 0x165   :  { %v549_v63 = vpop.eup %548 }
 0x166   :  { %v225_v1 = vadd.f32 %v491_v61, %v217_v62  ;;  %v330_v2 = vmul.f32 %v549_v63, %v318_v39 }
 0x168   :  { %v226_v4 = vmax.f32 %v225_v1, 0.0  ;;  %v338_v5 = vmul.f32 %v494_v0, %v330_v2 }
 0x16a   :  { %526 = vmatmul.mubr.msk.f32.vlgmr.msra.gmra.mrb[0].mxu0 %vm187_vm2, %v226_v4  ;;  %v346_v6 = vadd.f32 %v495_v3, %v338_v5 }
 0x16c   :  { %v347_v7 = vmax.f32 %v346_v6, 0.0 }
 0x16e   :  { %350 = vrot.lane.b32.xlu0 %v347_v7, %s748_s4  ;;  %348 = vst.msk [vmem:[#allocation11] sm:$0xff] %vm187_vm2, %v347_v7 }
 0x16f   :  { %675 = shalt.err (!%p672_p2)
}
 0x170   :  { %s676_s1 = scalar_lea.hbm %s972_s12, 128 }
 0x171   :  { %p677_p3 = scmp.ne.s32.totalorder %s972_s12, %s676_s1  ;;  %p680_p4 = scmp.lt.u32.totalorder %s676_s1, %s972_s12 }
 0x173   :  { %p682_p5 = pnand %p680_p4, %p677_p3 }
 0x175   :  { %685 = shalt.err (!%p682_p5)
}
 0x176   :  { %453 = dma.vmem_to_hbm [thread:$0]  %s451_s18, 128, %s972_s12, [#allocation4]  }
 0x177   :  { %s686_s0 = scalar_lea.vmem %s461_s20, 128  ;;  %p691_p7 = scmp.lt.s32.totalorder %s461_s20, %s461_s20 }
 0x178   :  { %p687_p6 = scmp.ne.s32.totalorder %s461_s20, %s686_s0  ;;  %p692_p8 = scmp.lt.s32.totalorder %s686_s0, %s686_s0 }
 0x17a   :  { %p693_p9 = por %p692_p8, %p691_p7 }
 0x17c   :  { %p694_p10 = pnand %p693_p9, %p687_p6 }
 0x1e0   :  { %v351_v8 = vpop.permute.xlu0 %350 }
 0x1e1   :  { %353 = vst.msk [vmem:[#allocation12] sm:$0xff] %vm187_vm2, %v351_v8 }
 0x1e2   :  { %697 = shalt.err (!%p694_p10)
}
 0x1e3   :  { %s698_s28 = scalar_lea.hbm %s973_s13, 128 }
 0x1e4   :  { %p699_p11 = scmp.ne.s32.totalorder %s973_s13, %s698_s28  ;;  %p702_p12 = scmp.lt.u32.totalorder %s698_s28, %s973_s13 }
 0x1e6   :  { %p704_p13 = pnand %p702_p12, %p699_p11 }
 0x1e8   :  { %707 = shalt.err (!%p704_p13)
}
 0x1e9   :  { %463 = dma.vmem_to_hbm [thread:$0]  %s461_s20, 128, %s973_s13, [#allocation13]   ;;  %v496_v9 = vld [vmem:[%s971_s11] ss:$0 sm:$0xff] }
 0x1ea   :  { %s751_s16 = smov [#allocation14]  }
 0x1eb   :  { %s470_s4 = sshll.u32 %s751_s16, 4  ;;  %s471_s4 = int_to_ptr.vmem [resolvable:$true] %s470_s4 }
 0x1ec   :  { %s708_s5 = scalar_lea.vmem %s471_s4, 128  ;;  %p713_p1 = scmp.lt.s32.totalorder %s471_s4, %s471_s4 }
 0x1ed   :  { %p709_p0 = scmp.ne.s32.totalorder %s471_s4, %s708_s5  ;;  %p714_p2 = scmp.lt.s32.totalorder %s708_s5, %s708_s5 }
 0x1ef   :  { %p715_p3 = por %p714_p2, %p713_p1 }
 0x1f1   :  { %p716_p4 = pnand %p715_p3, %p709_p0 }
 0x23d   :  { %v434_v10 = vpop.f32.mrb[0].mxu0 }
 0x23e   :  { %v435_v11 = vadd.f32 %v496_v9, %v434_v10  ;;  %v527_v12 = vpop.f32.mrb[1].mxu0 }
 0x240   :  { %v438_v13 = vsub.f32 0.0, %v435_v11 }
 0x242   :  { %v439_v14 = vmul.f32 1.442695, %v438_v13 }
 0x244   :  { %550 = vpow2.f32 %v439_v14 }
 0x24e   :  { %v551_v15 = vpop.eup %550 }
 0x24f   :  { %v441_v16 = vadd.f32 1.0, %v551_v15 }
 0x251   :  { %552 = vrcp.f32 %v441_v16 }
 0x25b   :  { %v553_v17 = vpop.eup %552 }
 0x25c   :  { %443 = vst [vmem:[#allocation14] sm:$0xff] %v553_v17 }
 0x25d   :  { %719 = shalt.err (!%p716_p4)
}
 0x25e   :  { %s720_s18 = scalar_lea.hbm %s974_s14, 128 }
 0x25f   :  { %p721_p5 = scmp.ne.s32.totalorder %s974_s14, %s720_s18  ;;  %p724_p6 = scmp.lt.u32.totalorder %s720_s18, %s974_s14 }
 0x261   :  { %p726_p7 = pnand %p724_p6, %p721_p5 }
 0x263   :  { %729 = shalt.err (!%p726_p7)
}
 0x264   :  { %473 = dma.vmem_to_hbm [thread:$0]  %s471_s4, 128, %s974_s14, [#allocation13]  }
 0x265   :  { %736 = dma.done.wait [#allocation4], 128  }
 0x266   :  { %737 = vsyncadd [#allocation4], 4294967168 }
 0x267   :  { %738 = dma.done.wait [#allocation13], 256  }
 0x268   :  { %739 = vsyncadd [#allocation13], 4294967040 }
 0x269   :  { %483 = vsyncpa [#allocation3], 1 }
 0x26a   :  { %484 = vsyncpa [#allocation6], 1 }
 0x26b   :  { %485 = vsyncpa [#allocation9], 1 }
 0x26c   :  { %486 = vsyncpa [#allocation4], 1 }
 0x26d   :  { %487 = vsyncpa [#allocation13], 1 }

</bundles_post_ra>
